<compile_context>
chip_gen: v7x
topology: tpu7x:2x2x1
jax: 0.10.0
libtpu: 0.0.40
codegen_flags: <defaults>
</compile_context>

<pallas_src>
import jax
import jax.numpy as jnp
from jax import lax
from jax.experimental import pallas as pl
from jax.experimental.pallas import tpu as pltpu

EPS = 1e-5
LANE = 128


def _round_up(v, m):
    return ((v + m - 1) // m) * m


# ----------------------------------- Pallas kernel -----------------------------------

def ff_cn_fc_sbp_kernel(x_ref, wblk_ref, bcn_ref, w1_ref, b1_ref,
                        wh_ref, bh_ref, wft_ref, out_ref):
    mdt = wblk_ref.dtype  # MXU operand dtype (f32 or bf16); accumulation is always f32.

    # conv(kernel=1) + bn0 + conv-bias + bn_cn folded into one block-diagonal matmul.
    x = x_ref[...].astype(mdt)                                               # (TN, I*L)
    feat = jnp.dot(x, wblk_ref[...], preferred_element_type=jnp.float32)     # (TN, F)
    feat = jnp.maximum(feat + bcn_ref[...], 0.0)

    # Lay1: Linear (bn1 scale folded into columns) + bias (bn1 shift folded) + ReLU.
    h = jnp.dot(feat.astype(mdt), w1_ref[...], preferred_element_type=jnp.float32)
    h = jnp.maximum(h + b1_ref[...], 0.0)                                    # (TN, H)

    # hiddenLayers (AllLayers): Linear + BN(eval, folded) + ReLU, statically unrolled.
    # TODO(synk): switch to lax.fori_loop(..., unroll=True) if FClayerNum grows beyond a few.
    for k in range(wh_ref.shape[0]):
        h = jnp.dot(h.astype(mdt), wh_ref[k], preferred_element_type=jnp.float32) + bh_ref[k]
        h = jnp.maximum(h, 0.0)

    # LinF (no bias) with bnF eval scale folded in, computed transposed:
    #   out_t[s, n] = sum_h wft[s, h] * h[n, h]   ->  (S, TN), lane-dense on the batch axis.
    out_ref[...] = lax.dot_general(
        wft_ref[...], h.astype(mdt),
        dimension_numbers=(((1,), (1,)), ((), ())),
        preferred_element_type=jnp.float32)


def ff_cn_fc_sbp_forward(x, kp, num_states, *, tn=1024):
    """x: (N, input_size, ConvSize), f32 or bf16. Returns (N, num_states) float32."""
    N, I, L = x.shape
    IL = I * L
    x_flat = x.reshape(N, IL)          # no dtype cast: accept producer dtype (f32 or bf16)

    F = kp["wblk"].shape[-1]
    H = kp["w1"].shape[-1]
    Lh = kp["wh"].shape[0]
    S = kp["wf_t"].shape[0]

    # Batch tile: large (amortize per-grid-step overhead), lane-dense when the batch allows,
    # and capped so the grid has >= 2 steps on big batches (v7x has 2 TensorCores).
    if N >= 2 * LANE:
        TN = min(_round_up(tn, LANE), _round_up(pl.cdiv(N, 2), LANE))
    elif N >= LANE:
        TN = _round_up(N, LANE)
    else:
        TN = _round_up(max(N, 1), 8)
    G = pl.cdiv(N, TN)
    Np = G * TN
    if Np != N:
        x_flat = jnp.pad(x_flat, ((0, Np - N), (0, 0)))

    # VMEM limit sized from the actual footprint (double-buffered x/out tiles + weights +
    # f32 intermediates) instead of a blanket limit; stays tiny even at TN=2048.
    weights = (kp["wblk"], kp["bcn"], kp["w1"], kp["b1"], kp["wh"], kp["bh"], kp["wf_t"])
    wbytes = sum(int(w.size) * jnp.dtype(w.dtype).itemsize for w in weights)
    io_bytes = TN * IL * jnp.dtype(x_flat.dtype).itemsize + S * TN * 4
    interm_bytes = 6 * TN * max(F, H) * 4
    vmem_limit = 2 * (io_bytes + wbytes) + interm_bytes + (2 << 20)
    vmem_limit = int(min(max(vmem_limit, 4 << 20), 64 << 20))

    const2 = lambda i: (0, 0)
    const3 = lambda i: (0, 0, 0)

    out_t = pl.pallas_call(
        ff_cn_fc_sbp_kernel,
        out_shape=jax.ShapeDtypeStruct((S, Np), jnp.float32),
        grid=(G,),
        in_specs=[
            pl.BlockSpec((TN, IL), lambda i: (i, 0)),   # x tile (pipelined over batch)
            pl.BlockSpec((IL, F), const2),              # block-diagonal conv/bn0/bn_cn weight
            pl.BlockSpec((1, F), const2),               # folded conv/bn_cn bias
            pl.BlockSpec((F, H), const2),               # Lay1 weight (bn1 scale folded)
            pl.BlockSpec((1, H), const2),               # Lay1 bias (bn1 shift folded)
            pl.BlockSpec((Lh, H, H), const3),           # hidden-layer weights
            pl.BlockSpec((Lh, 1, H), const3),           # hidden-layer biases
            pl.BlockSpec((S, H), const2),               # LinF weight, transposed, bnF folded
        ],
        out_specs=pl.BlockSpec((S, TN), lambda i: (0, i)),   # (S, N): batch on lane axis
        compiler_params=pltpu.CompilerParams(
            dimension_semantics=("parallel",),
            vmem_limit_bytes=vmem_limit,
        ),
    )(x_flat, kp["wblk"], kp["bcn"], kp["w1"], kp["b1"], kp["wh"], kp["bh"], kp["wf_t"])

    # Drop padded batch columns (garbage from padded rows) and transpose back to (N, S).
    return out_t[:, :N].T[:, :num_states]


# ----------------------- deterministic parameter construction -----------------------

def init_raw_params(key, input_size, hidden_size, fc_layer_num, conv_size,
                    conv_size_out, num_states):
    I, H, L, Co, S = input_size, hidden_size, conv_size, conv_size_out, num_states
    Lh = fc_layer_num - 2
    F = I * Co
    keys = iter(jax.random.split(key, 64))
    nrm = lambda shape: jax.random.normal(next(keys), shape, dtype=jnp.float32)

    def bn_state(shape):
        return dict(gamma=1.0 + 0.1 * nrm(shape), beta=0.1 * nrm(shape),
                    rm=0.1 * nrm(shape), rv=1.0 + 0.1 * jnp.abs(nrm(shape)))

    raw = {}
    raw["bn0"] = bn_state((I,))
    raw["Wcn"] = nrm((Co, L)) * jnp.sqrt(2.0 / L)          # kaiming_normal_, fan_in = ConvSize*1
    raw["bcn"] = jnp.zeros((Co,), jnp.float32)
    raw["bn_cn"] = bn_state((F,))                          # torch flatten order f = co*I + i
    raw["W1"] = nrm((H, F)) * jnp.sqrt(2.0 / F)
    raw["b1"] = jnp.zeros((H,), jnp.float32)
    raw["bn1"] = bn_state((H,))
    raw["Wh"] = nrm((Lh, H, H)) * jnp.sqrt(2.0 / H)
    raw["bh"] = jnp.zeros((Lh, H), jnp.float32)
    raw["bnh"] = bn_state((Lh, H))
    raw["WF"] = nrm((S, H)) * jnp.sqrt(2.0 / H)
    raw["bnF_rv"] = 1.0 + 0.1 * jnp.abs(nrm((S,)))         # bnF running_var (running_mean forced 0)
    return raw


def to_kernel_params(raw, I, L, Co, H, S, *, mxu_dtype=jnp.float32):
    """All folding is done in f32 and is algebraically exact for eval-mode semantics."""
    def affine(bn):
        s = bn["gamma"] / jnp.sqrt(bn["rv"] + EPS)
        return s, bn["beta"] - bn["rm"] * s

    s0, t0 = affine(raw["bn0"])                            # (I,)
    scn, tcn = affine(raw["bn_cn"])                        # (F,), f = co*I + i
    s1, t1 = affine(raw["bn1"])                            # (H,)
    sh, th = affine(raw["bnh"])                            # (Lh, H)
    sf = 1.0 / jnp.sqrt(raw["bnF_rv"] + EPS)               # (S,)

    F = Co * I
    Lh = raw["Wh"].shape[0]
    scn2 = scn.reshape(Co, I)
    tcn2 = tcn.reshape(Co, I)

    # Block-diagonal conv weight:  Wblk[i*L + l, co*I + i] = Wcn[co,l] * s0[i] * scn[co*I+i]
    T = raw["Wcn"].T[None, :, :] * s0[:, None, None] * scn2.T[:, None, :]   # (I, L, Co)
    wblk = (T[:, :, :, None] * jnp.eye(I, dtype=jnp.float32)[:, None, None, :]
            ).reshape(I * L, F)                                             # (I*L, F)

    # Folded bias: (t0[i]*sum_l Wcn[co,l] + bcn[co]) * scn[f] + tcn[f]
    wsum = jnp.sum(raw["Wcn"], axis=1)                                      # (Co,)
    cbias = wsum[:, None] * t0[None, :] + raw["bcn"][:, None]               # (Co, I)
    bcn = (cbias * scn2 + tcn2).reshape(1, F)

    w1 = raw["W1"].T * s1[None, :]                                          # (F, H)
    b1 = (raw["b1"] * s1 + t1).reshape(1, H)

    wh = jnp.transpose(raw["Wh"], (0, 2, 1)) * sh[:, None, :]               # (Lh, H, H)
    bh = (raw["bh"] * sh + th).reshape(Lh, 1, H)

    wf_t = raw["WF"] * sf[:, None]                                          # (S, H), row-scaled

    md = mxu_dtype
    return dict(wblk=wblk.astype(md), bcn=bcn,
                w1=w1.astype(md), b1=b1,
                wh=wh.astype(md), bh=bh,
                wf_t=wf_t.astype(md))


# ----------------------- pure-JAX reference (torch-order math) -----------------------

def reference_forward(x, raw):
    hp = jax.lax.Precision.HIGHEST
    bn0 = raw["bn0"]
    y = ((x - bn0["rm"][None, :, None]) / jnp.sqrt(bn0["rv"] + EPS)[None, :, None]
         * bn0["gamma"][None, :, None] + bn0["beta"][None, :, None])
    c = jnp.einsum("ol,nil->noi", raw["Wcn"], y, precision=hp) + raw["bcn"][None, :, None]
    N = x.shape[0]
    flat = c.reshape(N, -1)
    bnc = raw["bn_cn"]
    feat = jnp.maximum((flat - bnc["rm"]) / jnp.sqrt(bnc["rv"] + EPS)
                       * bnc["gamma"] + bnc["beta"], 0.0)
    h = jnp.dot(feat, raw["W1"].T, precision=hp) + raw["b1"]
    bn1 = raw["bn1"]
    h = jnp.maximum((h - bn1["rm"]) / jnp.sqrt(bn1["rv"] + EPS)
                    * bn1["gamma"] + bn1["beta"], 0.0)
    bnh = raw["bnh"]
    for k in range(raw["Wh"].shape[0]):
        h = jnp.dot(h, raw["Wh"][k].T, precision=hp) + raw["bh"][k]
        h = jnp.maximum((h - bnh["rm"][k]) / jnp.sqrt(bnh["rv"][k] + EPS)
                        * bnh["gamma"][k] + bnh["beta"][k], 0.0)
    return jnp.dot(h, raw["WF"].T, precision=hp) / jnp.sqrt(raw["bnF_rv"] + EPS)[None, :]


if __name__ == "__main__":
    # Module hyper-parameters (small; input_size*ConvSize = 128 -> lane-dense x tiles).
    batch, input_size, hidden_size = 8, 16, 32
    fc_layer_num, conv_size, conv_size_out, num_states = 4, 8, 4, 8

    key = jax.random.PRNGKey(0)
    kp_key, kx_key = jax.random.split(key)
    raw = init_raw_params(kp_key, input_size, hidden_size, fc_layer_num,
                          conv_size, conv_size_out, num_states)
    # x: (N, input_size, ConvSize).  BadChannels defaults to [] -> zeroing is a no-op.
    x = jax.random.normal(kx_key, (batch, input_size, conv_size), dtype=jnp.float32)

    ref = reference_forward(x, raw)

    # --- f32 path: exact eval-mode semantics (all folds are exact algebra) ---
    kp32 = to_kernel_params(raw, input_size, conv_size, conv_size_out,
                            hidden_size, num_states, mxu_dtype=jnp.float32)
    out32 = jax.block_until_ready(ff_cn_fc_sbp_forward(x, kp32, num_states))
    assert out32.shape == (batch, num_states)
    assert bool(jnp.all(jnp.isfinite(out32)))
    assert bool(jnp.allclose(out32, ref, atol=2e-3, rtol=2e-3)), \
        f"f32 max abs err {float(jnp.max(jnp.abs(out32 - ref)))}"

    # --- bf16 production path: bf16 weights AND bf16 x at the pallas_call boundary
    # (simulating an upstream producer that already emits bf16; the wrapper itself never
    # casts x).  bf16 operands carry ~3 significant digits, so this is an algorithm-level
    # smoke check, not a bit-accuracy check.
    kpbf = to_kernel_params(raw, input_size, conv_size, conv_size_out,
                            hidden_size, num_states, mxu_dtype=jnp.bfloat16)
    x_bf = x.astype(jnp.bfloat16)   # test-harness stand-in for a bf16 upstream producer
    outbf = jax.block_until_ready(ff_cn_fc_sbp_forward(x_bf, kpbf, num_states))
    assert outbf.shape == (batch, num_states)
    assert bool(jnp.all(jnp.isfinite(outbf)))
    rel = float(jnp.max(jnp.abs(outbf - ref)) / (jnp.max(jnp.abs(ref)) + 1e-6))
    assert rel < 0.1, f"bf16 relative err {rel}"

    print("KERNEL_OK")
</pallas_src>

<mosaic_0001>
module attributes {stable_mosaic.version = 11 : i64} {
  func.func @ff_cn_fc_sbp_kernel(%arg0: i32, %arg1: memref<8x128xf32, #tpu.memory_space<vmem>>, %arg2: memref<128x64xf32, #tpu.memory_space<vmem>>, %arg3: memref<1x64xf32, #tpu.memory_space<vmem>>, %arg4: memref<64x32xf32, #tpu.memory_space<vmem>>, %arg5: memref<1x32xf32, #tpu.memory_space<vmem>>, %arg6: memref<2x32x32xf32, #tpu.memory_space<vmem>>, %arg7: memref<2x1x32xf32, #tpu.memory_space<vmem>>, %arg8: memref<8x32xf32, #tpu.memory_space<vmem>>, %arg9: memref<8x8xf32, #tpu.memory_space<vmem>>) attributes {dimension_semantics = [#tpu.dimension_semantics<parallel>], iteration_bounds = array<i64: 1>, scalar_prefetch = 0 : i64, scratch_operands = 0 : i64, tpu.core_type = #tpu.core_type<tc>, window_params = [{transform_indices = @transform_0, window_bounds = array<i64: 8, 128>}, {pipeline_mode = #tpu.pipeline_mode<synchronous>, transform_indices = @transform_1, window_bounds = array<i64: 128, 64>}, {pipeline_mode = #tpu.pipeline_mode<synchronous>, transform_indices = @transform_2, window_bounds = array<i64: 1, 64>}, {pipeline_mode = #tpu.pipeline_mode<synchronous>, transform_indices = @transform_3, window_bounds = array<i64: 64, 32>}, {pipeline_mode = #tpu.pipeline_mode<synchronous>, transform_indices = @transform_4, window_bounds = array<i64: 1, 32>}, {pipeline_mode = #tpu.pipeline_mode<synchronous>, transform_indices = @transform_5, window_bounds = array<i64: 2, 32, 32>}, {pipeline_mode = #tpu.pipeline_mode<synchronous>, transform_indices = @transform_6, window_bounds = array<i64: 2, 1, 32>}, {pipeline_mode = #tpu.pipeline_mode<synchronous>, transform_indices = @transform_7, window_bounds = array<i64: 8, 32>}, {transform_indices = @transform_8, window_bounds = array<i64: 8, 8>}]} {
    %c0 = arith.constant 0 : index
    %c0_0 = arith.constant 0 : index
    %0 = vector.load %arg1[%c0, %c0_0] : memref<8x128xf32, #tpu.memory_space<vmem>>, vector<8x128xf32>
    %c0_1 = arith.constant 0 : index
    %c0_2 = arith.constant 0 : index
    %1 = vector.load %arg2[%c0_1, %c0_2] : memref<128x64xf32, #tpu.memory_space<vmem>>, vector<128x64xf32>
    %cst = arith.constant dense<0.000000e+00> : vector<8x64xf32>
    %2 = tpu.matmul %0, %1, %cst {dimension_numbers = #tpu.dot_dimension_numbers<[1], [0], [0], [1], [0, 0, 1, 1], [], []>} : vector<8x128xf32>, vector<128x64xf32>, vector<8x64xf32> -> vector<8x64xf32>
    %c0_3 = arith.constant 0 : index
    %c0_4 = arith.constant 0 : index
    %3 = vector.load %arg3[%c0_3, %c0_4] : memref<1x64xf32, #tpu.memory_space<vmem>>, vector<1x64xf32>
    %4 = vector.broadcast %3 : vector<1x64xf32> to vector<8x64xf32>
    %5 = arith.addf %2, %4 : vector<8x64xf32>
    %cst_5 = arith.constant 0.000000e+00 : f32
    %6 = vector.broadcast %cst_5 : f32 to vector<8x64xf32>
    %7 = arith.maximumf %5, %6 : vector<8x64xf32>
    %c0_6 = arith.constant 0 : index
    %c0_7 = arith.constant 0 : index
    %8 = vector.load %arg4[%c0_6, %c0_7] : memref<64x32xf32, #tpu.memory_space<vmem>>, vector<64x32xf32>
    %cst_8 = arith.constant dense<0.000000e+00> : vector<8x32xf32>
    %9 = tpu.matmul %7, %8, %cst_8 {dimension_numbers = #tpu.dot_dimension_numbers<[1], [0], [0], [1], [0, 0, 1, 1], [], []>} : vector<8x64xf32>, vector<64x32xf32>, vector<8x32xf32> -> vector<8x32xf32>
    %c0_9 = arith.constant 0 : index
    %c0_10 = arith.constant 0 : index
    %10 = vector.load %arg5[%c0_9, %c0_10] : memref<1x32xf32, #tpu.memory_space<vmem>>, vector<1x32xf32>
    %11 = vector.broadcast %10 : vector<1x32xf32> to vector<8x32xf32>
    %12 = arith.addf %9, %11 : vector<8x32xf32>
    %cst_11 = arith.constant 0.000000e+00 : f32
    %13 = vector.broadcast %cst_11 : f32 to vector<8x32xf32>
    %14 = arith.maximumf %12, %13 : vector<8x32xf32>
    %c0_12 = arith.constant 0 : index
    %c0_13 = arith.constant 0 : index
    %c0_14 = arith.constant 0 : index
    %15 = vector.load %arg6[%c0_12, %c0_13, %c0_14] : memref<2x32x32xf32, #tpu.memory_space<vmem>>, vector<1x32x32xf32>
    %16 = vector.shape_cast %15 : vector<1x32x32xf32> to vector<32x32xf32>
    %cst_15 = arith.constant dense<0.000000e+00> : vector<8x32xf32>
    %17 = tpu.matmul %14, %16, %cst_15 {dimension_numbers = #tpu.dot_dimension_numbers<[1], [0], [0], [1], [0, 0, 1, 1], [], []>} : vector<8x32xf32>, vector<32x32xf32>, vector<8x32xf32> -> vector<8x32xf32>
    %c0_16 = arith.constant 0 : index
    %c0_17 = arith.constant 0 : index
    %c0_18 = arith.constant 0 : index
    %18 = vector.load %arg7[%c0_16, %c0_17, %c0_18] : memref<2x1x32xf32, #tpu.memory_space<vmem>>, vector<1x1x32xf32>
    %19 = vector.shape_cast %18 : vector<1x1x32xf32> to vector<1x32xf32>
    %20 = vector.broadcast %19 : vector<1x32xf32> to vector<8x32xf32>
    %21 = arith.addf %17, %20 : vector<8x32xf32>
    %cst_19 = arith.constant 0.000000e+00 : f32
    %22 = vector.broadcast %cst_19 : f32 to vector<8x32xf32>
    %23 = arith.maximumf %21, %22 : vector<8x32xf32>
    %c1 = arith.constant 1 : index
    %c0_20 = arith.constant 0 : index
    %c0_21 = arith.constant 0 : index
    %24 = vector.load %arg6[%c1, %c0_20, %c0_21] : memref<2x32x32xf32, #tpu.memory_space<vmem>>, vector<1x32x32xf32>
    %25 = vector.shape_cast %24 : vector<1x32x32xf32> to vector<32x32xf32>
    %cst_22 = arith.constant dense<0.000000e+00> : vector<8x32xf32>
    %26 = tpu.matmul %23, %25, %cst_22 {dimension_numbers = #tpu.dot_dimension_numbers<[1], [0], [0], [1], [0, 0, 1, 1], [], []>} : vector<8x32xf32>, vector<32x32xf32>, vector<8x32xf32> -> vector<8x32xf32>
    %c1_23 = arith.constant 1 : index
    %c0_24 = arith.constant 0 : index
    %c0_25 = arith.constant 0 : index
    %27 = vector.load %arg7[%c1_23, %c0_24, %c0_25] : memref<2x1x32xf32, #tpu.memory_space<vmem>>, vector<1x1x32xf32>
    %28 = vector.shape_cast %27 : vector<1x1x32xf32> to vector<1x32xf32>
    %29 = vector.broadcast %28 : vector<1x32xf32> to vector<8x32xf32>
    %30 = arith.addf %26, %29 : vector<8x32xf32>
    %cst_26 = arith.constant 0.000000e+00 : f32
    %31 = vector.broadcast %cst_26 : f32 to vector<8x32xf32>
    %32 = arith.maximumf %30, %31 : vector<8x32xf32>
    %c0_27 = arith.constant 0 : index
    %c0_28 = arith.constant 0 : index
    %33 = vector.load %arg8[%c0_27, %c0_28] : memref<8x32xf32, #tpu.memory_space<vmem>>, vector<8x32xf32>
    %cst_29 = arith.constant dense<0.000000e+00> : vector<8x8xf32>
    %34 = tpu.matmul %33, %32, %cst_29 {dimension_numbers = #tpu.dot_dimension_numbers<[1], [1], [0], [0], [0, 0, 1, 0], [], []>} : vector<8x32xf32>, vector<8x32xf32>, vector<8x8xf32> -> vector<8x8xf32>
    %c0_30 = arith.constant 0 : index
    %c0_31 = arith.constant 0 : index
    %35 = vector.load %arg9[%c0_30, %c0_31] : memref<8x8xf32, #tpu.memory_space<vmem>>, vector<8x8xf32>
    tpu.vector_store %arg9[%c0_30, %c0_31], %34 {strides = array<i32>} : memref<8x8xf32, #tpu.memory_space<vmem>>, vector<8x8xf32>,
    return
  }
  func.func @transform_0(%arg0: i32) -> (i32, i32) {
    %c0_i32 = arith.constant 0 : i32
    %c0_i32_0 = arith.constant 0 : i32
    return %arg0, %c0_i32 : i32, i32
  }
  func.func @transform_1(%arg0: i32) -> (i32, i32) {
    %c0_i32 = arith.constant 0 : i32
    %c0_i32_0 = arith.constant 0 : i32
    %c0_i32_1 = arith.constant 0 : i32
    return %c0_i32, %c0_i32_0 : i32, i32
  }
  func.func @transform_2(%arg0: i32) -> (i32, i32) {
    %c0_i32 = arith.constant 0 : i32
    %c0_i32_0 = arith.constant 0 : i32
    %c0_i32_1 = arith.constant 0 : i32
    return %c0_i32, %c0_i32_0 : i32, i32
  }
  func.func @transform_3(%arg0: i32) -> (i32, i32) {
    %c0_i32 = arith.constant 0 : i32
    %c0_i32_0 = arith.constant 0 : i32
    %c0_i32_1 = arith.constant 0 : i32
    return %c0_i32, %c0_i32_0 : i32, i32
  }
  func.func @transform_4(%arg0: i32) -> (i32, i32) {
    %c0_i32 = arith.constant 0 : i32
    %c0_i32_0 = arith.constant 0 : i32
    %c0_i32_1 = arith.constant 0 : i32
    return %c0_i32, %c0_i32_0 : i32, i32
  }
  func.func @transform_5(%arg0: i32) -> (i32, i32, i32) {
    %c0_i32 = arith.constant 0 : i32
    %c0_i32_0 = arith.constant 0 : i32
    %c0_i32_1 = arith.constant 0 : i32
    %c0_i32_2 = arith.constant 0 : i32
    return %c0_i32, %c0_i32_0, %c0_i32_1 : i32, i32, i32
  }
  func.func @transform_6(%arg0: i32) -> (i32, i32, i32) {
    %c0_i32 = arith.constant 0 : i32
    %c0_i32_0 = arith.constant 0 : i32
    %c0_i32_1 = arith.constant 0 : i32
    %c0_i32_2 = arith.constant 0 : i32
    return %c0_i32, %c0_i32_0, %c0_i32_1 : i32, i32, i32
  }
  func.func @transform_7(%arg0: i32) -> (i32, i32) {
    %c0_i32 = arith.constant 0 : i32
    %c0_i32_0 = arith.constant 0 : i32
    %c0_i32_1 = arith.constant 0 : i32
    return %c0_i32, %c0_i32_0 : i32, i32
  }
  func.func @transform_8(%arg0: i32) -> (i32, i32) {
    %c0_i32 = arith.constant 0 : i32
    %c0_i32_0 = arith.constant 0 : i32
    return %c0_i32, %arg0 : i32, i32
  }
}

</mosaic_0001>

<bundles_post_ra>
// kernel: tpu_custom_call.1
= control target key start
LH: loop header
LB: loop body
LE: loop exit
PB: predicated region body
PF: predicated region fallthrough
CT: control target
= control target key end

     0   :  { %v690_v3 = vmov 0.0|0.0   ;;  %vm691_vm0 = vmmov 0   ;;  %v692_v6 = vmov 0.0   ;;  %s896_s0 = inlined_call_operand.vmem [shape: f32[8,128], index: 0, kind: input, shape index: {}]   ;;  %s897_s1 = inlined_call_operand.vmem [shape: f32[128,64], index: 1, kind: input, shape index: {}]   ;;  %s898_s2 = inlined_call_operand.vmem [shape: f32[1,64], index: 2, kind: input, shape index: {}]   ;;  %s899_s3 = inlined_call_operand.vmem [shape: f32[64,32], index: 3, kind: input, shape index: {}]   ;;  %s900_s4 = inlined_call_operand.vmem [shape: f32[1,32], index: 4, kind: input, shape index: {}]   ;;  %s901_s5 = inlined_call_operand.vmem [shape: f32[2,32,32], index: 5, kind: input, shape index: {}]   ;;  %s902_s6 = inlined_call_operand.vmem [shape: f32[2,1,32], index: 6, kind: input, shape index: {}]   ;;  %s903_s7 = inlined_call_operand.vmem [shape: f32[8,32], index: 7, kind: input, shape index: {}]   ;;  %s904_s8 = inlined_call_operand.hbm [shape: f32[8,8], index: 8, kind: output, shape index: {}]  }
   0x1   :  { %v31_v0 = vld [vmem:[%s897_s1] sm:$0xff]  ;;  %v32_v1 = vld [vmem:[%s897_s1 + $0x8] sm:$0xff]  ;;  %v33_v2 = vld [vmem:[%s897_s1 + $0x10] sm:$0xff]  ;;  %614 = vmatprep.subr.bf16.mxu0 %v690_v3  ;;  %565 = vmatprep.mubr.msk.f32.mxu0 %vm691_vm0, %v692_v6 }
   0x2   :  { %v615_v4 = vpack.c.bf16 %v32_v1, %v31_v0  ;;  %v34_v5 = vld [vmem:[%s897_s1 + $0x18] sm:$0xff]  ;;  %638 = vmatprep.subr.bf16.mxu1 %v690_v3  ;;  %584 = vmatprep.mubr.msk.f32.mxu1 %vm691_vm0, %v692_v6  ;;  %v35_v8 = vld [vmem:[%s897_s1 + $0x20] sm:$0xff]  ;;  %v36_v9 = vld [vmem:[%s897_s1 + $0x28] sm:$0xff] }
   0x3   :  { %v618_v7 = vpack.c.bf16 %v34_v5, %v33_v2  ;;  %v125_v10 = vld [vmem:[%s899_s3] sm:$0xff]  ;;  %v126_v11 = vld [vmem:[%s899_s3 + $0x8] sm:$0xff]  ;;  %v127_v12 = vld [vmem:[%s899_s3 + $0x10] sm:$0xff]  ;;  %v621_v14 = vpack.c.bf16 %v36_v9, %v35_v8 }
   0x4   :  { %616 = vmatpush3.bf16.msra.mxu0 %v615_v4  ;;  %v128_v13 = vld [vmem:[%s899_s3 + $0x18] sm:$0xff]  ;;  %v639_v15 = vpack.c.bf16 %v126_v11, %v125_v10  ;;  %v37_v16 = vld [vmem:[%s897_s1 + $0x30] sm:$0xff] }
   0x5   :  { %617 = vmatprep.subr.bf16.mxu0 %v690_v3  ;;  %v38_v17 = vld [vmem:[%s897_s1 + $0x38] sm:$0xff] }
   0x8   :  { %619 = vmatpush3.bf16.msra.mxu0 %v618_v7 }
   0x9   :  { %620 = vmatprep.subr.bf16.mxu0 %v690_v3 }
   0xa   :  { %13 = vsyncpa [#allocation3], 0  ;;  %640 = vmatpush3.bf16.msra.mxu1 %v639_v15  ;;  %v642_v18 = vpack.c.bf16 %v128_v13, %v127_v12  ;;  %v129_v19 = vld [vmem:[%s899_s3 + $0x20] sm:$0xff]  ;;  %v130_v20 = vld [vmem:[%s899_s3 + $0x28] sm:$0xff]  ;;  %v624_v21 = vpack.c.bf16 %v38_v17, %v37_v16  ;;  %vm140_vm1 = vcmask 523264   ;;  %vm226_vm2 = vcmask 261120  }
   0xb   :  { %641 = vmatprep.subr.bf16.mxu1 %v690_v3  ;;  %v39_v22 = vld [vmem:[%s897_s1 + $0x40] sm:$0xff]  ;;  %v40_v23 = vld [vmem:[%s897_s1 + $0x48] sm:$0xff]  ;;  %v645_v24 = vpack.c.bf16 %v130_v20, %v129_v19  ;;  %v41_v26 = vld [vmem:[%s897_s1 + $0x50] sm:$0xff]  ;;  %vm465_vm3 = vcmask 64512  }
   0xc   :  { %622 = vmatpush3.bf16.msra.mxu0 %v621_v14  ;;  %v627_v25 = vpack.c.bf16 %v40_v23, %v39_v22  ;;  %v42_v27 = vld [vmem:[%s897_s1 + $0x58] sm:$0xff]  ;;  %v43_v29 = vld [vmem:[%s897_s1 + $0x60] sm:$0xff]  ;;  %v44_v30 = vld [vmem:[%s897_s1 + $0x68] sm:$0xff] }
   0xd   :  { %623 = vmatprep.subr.bf16.mxu0 %v690_v3  ;;  %v630_v28 = vpack.c.bf16 %v42_v27, %v41_v26  ;;  %v633_v31 = vpack.c.bf16 %v44_v30, %v43_v29  ;;  %v45_v32 = vld [vmem:[%s897_s1 + $0x70] sm:$0xff]  ;;  %v46_v33 = vld [vmem:[%s897_s1 + $0x78] sm:$0xff]  ;;  %v30_v35 = vld [vmem:[%s896_s0] sm:$0xff]  ;;  %s693_s1 = smov [#allocation2]  }
   0xe   :  { %643 = vmatpush3.bf16.msra.mxu1 %v642_v18  ;;  %v636_v34 = vpack.c.bf16 %v46_v33, %v45_v32  ;;  %v131_v36 = vld [vmem:[%s899_s3 + $0x30] sm:$0xff]  ;;  %v132_v37 = vld [vmem:[%s899_s3 + $0x38] sm:$0xff]  ;;  %v481_v39 = vld [vmem:[%s898_s2] ss:$0 sm:$0xff]  ;;  %s473_s9 = sshll.u32 %s693_s1, 4  ;;  %s474_s9 = int_to_ptr.vmem [resolvable:$true] %s473_s9 }
   0xf   :  { %644 = vmatprep.subr.bf16.mxu1 %v690_v3  ;;  %v648_v38 = vpack.c.bf16 %v132_v37, %v131_v36  ;;  %v215_v40 = vld [vmem:[%s901_s5] sm:$0xff]  ;;  %v216_v41 = vld [vmem:[%s901_s5 + $0x8] sm:$0xff]  ;;  %v217_v47 = vld [vmem:[%s901_s5 + $0x10] sm:$0xff]  ;;  %p671_p1 = scmp.lt.s32.totalorder %s474_s9, %s474_s9 }
  0x10   :  { %625 = vmatpush3.bf16.msra.mxu0 %v624_v21  ;;  %v651_v45 = vpack.c.bf16 %v216_v41, %v215_v40  ;;  %v218_v48 = vld [vmem:[%s901_s5 + $0x18] sm:$0xff]  ;;  %v482_v50 = vld [vmem:[%s900_s4] ss:$0 sm:$0xff]  ;;  %v487_v52 = vld [vmem:[%s901_s5 + $0x28] sm:$0xff] }
  0x11   :  { %626 = vmatprep.subr.bf16.mxu0 %v690_v3  ;;  %v654_v49 = vpack.c.bf16 %v218_v48, %v217_v47  ;;  %v486_v51 = vld [vmem:[%s901_s5 + $0x20] sm:$0xff]  ;;  %v488_v58 = vld [vmem:[%s901_s5 + $0x30] sm:$0xff]  ;;  %v489_v59 = vld [vmem:[%s901_s5 + $0x38] sm:$0xff] }
  0x12   :  { %646 = vmatpush3.bf16.msra.mxu1 %v645_v24  ;;  %v657_v56 = vpack.c.bf16 %v487_v52, %v486_v51  ;;  %v660_v60 = vpack.c.bf16 %v489_v59, %v488_v58  ;;  %v484_v61 = vld [vmem:[%s902_s6] ss:$0 sm:$0xff]  ;;  %v491_v2 = vld [vmem:[%s902_s6 + $0x1] ss:$0 sm:$0xff]  ;;  %s666_s6 = scalar_lea.vmem %s474_s9, 128 }
  0x13   :  { %647 = vmatprep.subr.bf16.mxu1 %v690_v3  ;;  %v388_v7 = vld [vmem:[%s903_s7] sm:$0xff]  ;;  %p667_p0 = scmp.ne.s32.totalorder %s474_s9, %s666_s6  ;;  %p672_p2 = scmp.lt.s32.totalorder %s666_s6, %s666_s6 }
  0x14   :  { %628 = vmatpush3.bf16.msra.mxu0 %v627_v25 }
  0x15   :  { %629 = vmatprep.subr.bf16.mxu0 %v690_v3  ;;  %p673_p3 = por %p672_p2, %p671_p1 }
  0x16   :  { %649 = vmatpush3.bf16.msra.mxu1 %v648_v38 }
  0x17   :  { %650 = vmatprep.subr.bf16.mxu1 %v690_v3  ;;  %p674_p4 = pnand %p673_p3, %p667_p0 }
  0x18   :  { %631 = vmatpush3.bf16.msra.mxu0 %v630_v28 }
  0x19   :  { %632 = vmatprep.subr.bf16.mxu0 %v690_v3 }
  0x1c   :  { %634 = vmatpush3.bf16.msra.mxu0 %v633_v31 }
  0x1d   :  { %635 = vmatprep.subr.bf16.mxu0 %v690_v3 }
  0x20   :  { %637 = vmatpush3.bf16.msra.mxu0 %v636_v34 }
  0x21   :  { %609 = vmatprep.subr.mxu0 %v692_v6 }
  0x23   :  { %566 = vmatmul.mubr.f32.vlgmr.msra.gmra.mrb[0].mxu0 %v30_v35 }
  0x24   :  { %611 = vmatprep.mubr.msk.f32.mxu0 %vm691_vm0, %v692_v6 }
  0xf6   :  { %v120_v42 = vpop.f32.mrb[0].mxu0 }
  0xf7   :  { %v121_v43 = vadd.f32 %v481_v39, %v120_v42  ;;  %v567_v44 = vpop.f32.mrb[1].mxu0 }
  0xf9   :  { %v124_v46 = vmax.f32 %v121_v43, 0.0 }
  0xfb   :  { %585 = vmatmul.mubr.msk.f32.vlgmr.msra.gmra.mrb[0].mxu1 %vm140_vm1, %v124_v46 }
  0xfc   :  { %652 = vmatpush3.bf16.msra.mxu1 %v651_v45  ;;  %595 = vmatprep.mubr.msk.f32.mxu1 %vm691_vm0, %v692_v6 }
  0xfd   :  { %653 = vmatprep.subr.bf16.mxu1 %v690_v3 }
 0x100   :  { %655 = vmatpush3.bf16.msra.mxu1 %v654_v49 }
 0x101   :  { %656 = vmatprep.subr.bf16.mxu1 %v690_v3 }
 0x1ce   :  { %v210_v53 = vpop.f32.mrb[0].mxu1 }
 0x1cf   :  { %v211_v54 = vadd.f32 %v482_v50, %v210_v53  ;;  %v586_v55 = vpop.f32.mrb[1].mxu1 }
 0x1d1   :  { %v214_v57 = vmax.f32 %v211_v54, 0.0 }
 0x1d3   :  { %596 = vmatmul.mubr.msk.f32.vlgmr.msra.gmra.mrb[2].mxu1 %vm226_vm2, %v214_v57 }
 0x1d4   :  { %658 = vmatpush3.bf16.msra.mxu1 %v657_v56  ;;  %606 = vmatprep.mubr.msk.f32.mxu1 %vm691_vm0, %v692_v6 }
 0x1d5   :  { %659 = vmatprep.subr.bf16.mxu1 %v690_v3 }
 0x1d8   :  { %661 = vmatpush3.bf16.msra.mxu1 %v660_v60 }
 0x2a6   :  { %v296_v62 = vpop.f32.mrb[2].mxu1 }
 0x2a7   :  { %v297_v63 = vadd.f32 %v484_v61, %v296_v62  ;;  %v597_v0 = vpop.f32.mrb[3].mxu1 }
 0x2a9   :  { %v300_v1 = vmax.f32 %v297_v63, 0.0 }
 0x2ab   :  { %607 = vmatmul.mubr.msk.f32.vlgmr.msra.gmra.mrb[4].mxu1 %vm226_vm2, %v300_v1 }
 0x37e   :  { %v383_v3 = vpop.f32.mrb[4].mxu1 }
 0x37f   :  { %v384_v4 = vadd.f32 %v491_v2, %v383_v3  ;;  %v608_v5 = vpop.f32.mrb[5].mxu1 }
 0x381   :  { %v387_v6 = vmax.f32 %v384_v4, 0.0 }
 0x383   :  { %610 = vmatpush3.xpose.msk.msra.mxu0 %vm226_vm2, %v387_v6 }
 0x386   :  { %612 = vmatmul.mubr.msk.f32.vlgmr.msra.gmra.mrb[2].mxu0 %vm226_vm2, %v388_v7 }
 0x459   :  { %v461_v8 = vpop.f32.mrb[2].mxu0 }
 0x45a   :  { %466 = vst.msk [vmem:[#allocation2] sm:$0xff] %vm465_vm3, %v461_v8  ;;  %v613_v9 = vpop.f32.mrb[3].mxu0 }
 0x45b   :  { %677 = shalt.err (!%p674_p4)
}
 0x45c   :  { %s678_s7 = scalar_lea.hbm %s904_s8, 128 }
 0x45d   :  { %p679_p5 = scmp.ne.s32.totalorder %s904_s8, %s678_s7  ;;  %p682_p6 = scmp.lt.u32.totalorder %s678_s7, %s904_s8 }
 0x45f   :  { %p684_p7 = pnand %p682_p6, %p679_p5 }
 0x461   :  { %687 = shalt.err (!%p684_p7)
}
 0x462   :  { %476 = dma.vmem_to_hbm [thread:$0]  %s474_s9, 128, %s904_s8, [#allocation3]  }
 0x463   :  { %688 = dma.done.wait [#allocation3], 128  }
 0x464   :  { %689 = vsyncadd [#allocation3], 4294967168 }
 0x465   :  { %480 = vsyncpa [#allocation3], 1 }

</bundles_post_ra>
